<compile_context>
chip_gen: v7x
topology: tpu7x:2x2x1
jax: 0.10.0
libtpu: 0.0.40
codegen_flags: <defaults>
</compile_context>

<pallas_src>
import functools

import jax
import jax.numpy as jnp
from jax import lax
from jax.experimental import pallas as pl
from jax.experimental.pallas import tpu as pltpu


_LANE = 128   # channel dims are padded to a multiple of this (lane width)
_HALO = 16    # extra L rows per tile; >=4 needed for correctness (see assert),
              # 16 keeps bf16 sublane packs aligned (R = TL + 16 is 16-aligned)

# Rows >= R-2 of the rolled copies hold wrap-around garbage; they are only safe
# because conv2 consumes h rows 0..TL+1 and the garbage sits at rows >= TL+14.
assert _HALO >= 4 and _HALO % 16 == 0


# ---------------------------------------------------------------------------
# sublane shift helper: shifted[i] = x[i + k]   (last k rows are don't-care).
# Implemented with pltpu.roll (XLU rotate).  The rotation convention (and bf16
# support) is probed once at runtime; on any problem we fall back to jnp.roll.
# ---------------------------------------------------------------------------
_SHIFT_IMPL = None


def _resolve_shift_impl():
    global _SHIFT_IMPL
    if _SHIFT_IMPL is not None:
        return _SHIFT_IMPL
    try:
        def probe(x_ref, o_ref):
            o_ref[...] = pltpu.roll(x_ref[...], 1, 0)

        x = (jnp.arange(16 * _LANE, dtype=jnp.float32) % 256).reshape(16, _LANE)
        x = x.astype(jnp.bfloat16)     # probe in bf16: kernel rolls bf16 tiles
        out = pl.pallas_call(
            probe, out_shape=jax.ShapeDtypeStruct((16, _LANE), jnp.bfloat16))(x)
        out = jax.block_until_ready(out)
        if bool(jnp.array_equal(out, jnp.roll(x, 1, axis=0))):
            _SHIFT_IMPL = "roll_np"      # pltpu.roll(x, s) == np.roll(x, s)
        elif bool(jnp.array_equal(out, jnp.roll(x, -1, axis=0))):
            _SHIFT_IMPL = "roll_rev"     # opposite rotation convention
        else:
            _SHIFT_IMPL = "jnp"
    except Exception:                    # lowering problem -> safe fallback
        _SHIFT_IMPL = "jnp"
    return _SHIFT_IMPL


def _shift_up(x, k):
    """Return y with y[i] = x[i + k] (rows >= R-k hold unused garbage)."""
    if k == 0:
        return x
    n = x.shape[0]
    if _SHIFT_IMPL == "roll_np":
        return pltpu.roll(x, n - k, 0)
    if _SHIFT_IMPL == "roll_rev":
        return pltpu.roll(x, k, 0)
    return jnp.roll(x, -k, axis=0)


# ---------------------------------------------------------------------------
# fused kernel: conv1 -> BN1 -> ReLU -> conv2 -> BN2 -> ReLU   (dropout = id)
# x stays in HBM; each step manually DMAs its halo'd L-window (double-buffered).
# ---------------------------------------------------------------------------
def _fused_conv_layer_kernel(x_hbm, w1_ref, s1_ref, b1_ref,
                             w2_ref, s2_ref, b2_ref, o_ref,
                             xbuf, sem, *, L, TL, NT):
    # x_hbm : (N, L_ceil + HALO, Cin_p) bf16 in HBM (left pad 2, zero padded)
    # w*_ref: (3*Cin_p, C1p) / (3*C1p, C2p) bf16 — conv taps stacked along K
    # s/b   : (1, C) f32 — folded BatchNorm affine
    # o_ref : (1, TL, C2p)
    # xbuf  : (2, R, Cin_p) bf16 VMEM double buffer, sem: DMA sems (2,)
    n = pl.program_id(0)
    l = pl.program_id(1)
    R = TL + _HALO
    slot = lax.rem(l, 2)

    def start_fetch(li, slot_i):
        off = pl.multiple_of(li * TL, 16)
        pltpu.make_async_copy(
            x_hbm.at[n, pl.ds(off, R), :], xbuf.at[slot_i], sem.at[slot_i],
        ).start()

    # The first L-tile of each sample was not prefetched by a previous step.
    @pl.when(l == 0)
    def _():
        start_fetch(l, slot)

    # Prefetch the next L-tile of the same sample while computing this one.
    # (l runs 0..NT-1 in order within a core because that grid axis is
    #  "arbitrary", so the tile waited below was always started.)
    @pl.when(l + 1 < NT)
    def _():
        start_fetch(l + 1, 1 - slot)

    # Wait for this tile's DMA (started just above, or by the previous step).
    pltpu.make_async_copy(
        x_hbm.at[n, pl.ds(pl.multiple_of(l * TL, 16), R), :],
        xbuf.at[slot], sem.at[slot],
    ).wait()

    # ---- conv1 as a single K=3*Cin MXU matmul (bf16 im2col via sublane rolls)
    xt = xbuf[slot]                                              # (R, Cin_p) bf16
    xc = jnp.concatenate([xt, _shift_up(xt, 1), _shift_up(xt, 2)], axis=1)
    h = jnp.dot(xc, w1_ref[...], preferred_element_type=jnp.float32)
    h = jnp.maximum(h * s1_ref[...] + b1_ref[...], 0.0)         # (R, C1p) f32

    # Row j of h is the block-1 activation at original position l*TL - 1 + j.
    # conv2's zero padding: positions outside [0, L) must contribute zero.
    pos = l * TL - 1 + lax.broadcasted_iota(jnp.int32, (R, 1), 0)
    hb = jnp.where((pos >= 0) & (pos < L), h, 0.0).astype(jnp.bfloat16)

    # ---- conv2 on the VMEM-resident bf16 intermediate (same im2col trick) ---
    hc = jnp.concatenate([hb, _shift_up(hb, 1), _shift_up(hb, 2)], axis=1)
    y = jnp.dot(hc, w2_ref[...], preferred_element_type=jnp.float32)
    y = jnp.maximum(y * s2_ref[...] + b2_ref[...], 0.0)         # (R, C2p) f32

    # rows [0, TL) are output positions [l*TL, l*TL + TL)
    o_ref[0] = y[:TL, :].astype(o_ref.dtype)
    # TODO(synk): training-mode dropout would mask here with pltpu PRNG bits.


# ---------------------------------------------------------------------------
# wrappers
# ---------------------------------------------------------------------------
def _round_up(x, m):
    return (x + m - 1) // m * m


def _pick_l_tile_and_vmem(cin_p, c1_p, c2_p):
    """Generation-aware (TL, vmem_limit_bytes) from an explicit VMEM budget."""
    try:
        vmem_cap = int(pltpu.get_tpu_info().vmem_capacity_bytes)
    except Exception:
        vmem_cap = 64 * 1024 * 1024                 # conservative (v7x-sized)
    if vmem_cap <= 64 * 1024 * 1024:                # v7x: 64 MiB/TC -> headroom
        vmem_limit, tl_cap = 48 * 1024 * 1024, 1024
    else:                                           # v5e / v6e: 128 MiB
        vmem_limit, tl_cap = 100 * 1024 * 1024, 2048
    # TODO(synk): single-buffer the constant weight blocks (pl.Buffered(1)) to
    # reclaim half of `weights` below once verified on all generations.
    weights = 2 * 2 * 3 * (cin_p * c1_p + c1_p * c2_p)   # bf16, x2 auto dbl-buf
    fixed = weights + (1 << 20)                          # scale/bias + slack
    per_row = (2 * 2 * cin_p            # x VMEM double buffer (bf16)
               + 2 * 3 * cin_p          # xc im2col (bf16)
               + 4 * c1_p + 2 * c1_p    # h (f32) + hb (bf16)
               + 2 * 3 * c1_p           # hc im2col (bf16)
               + 4 * c2_p               # y (f32)
               + 2 * 2 * c2_p)          # output block double buffer (bf16)
    avail = max(vmem_limit - fixed, 16 * per_row)
    tl = min(int(avail // per_row), tl_cap)
    tl = max(16, (tl // 16) * 16)
    return tl, vmem_limit


def _fold_bn(gamma, beta, mean, var, eps=1e-5):
    scale = gamma / jnp.sqrt(var + eps)
    return scale, beta - mean * scale


def _prep_conv(w_oik, c_in_p, c_out_p):
    """PyTorch (Cout, Cin, K=3) conv weight -> bf16 (3*Cin_p, Cout_p) im2col matrix."""
    c_out, c_in, _ = w_oik.shape
    w = jnp.transpose(w_oik, (2, 1, 0))                           # (3, Cin, Cout)
    w = jnp.pad(w, ((0, 0), (0, c_in_p - c_in), (0, c_out_p - c_out)))
    return w.reshape(3 * c_in_p, c_out_p).astype(jnp.bfloat16)


def _prep_affine(scale, bias, c_p):
    c = scale.shape[0]
    s = jnp.pad(scale, (0, c_p - c)).reshape(1, c_p).astype(jnp.float32)
    b = jnp.pad(bias, (0, c_p - c)).reshape(1, c_p).astype(jnp.float32)
    return s, b


def conv_layer_forward_nlc(x_nlc, params, *, out_dtype=jnp.bfloat16,
                           l_tile=None, trim=True):
    """Fused ConvLayer forward, channels-last: (N, L, Cin) -> (N, L, Cout).

    trim=False returns the lane-dense padded (N, L, C2_p) slab (bf16), letting a
    downstream fused op skip the channel-slice copy pass.
    """
    _resolve_shift_impl()

    N, L, Cin = x_nlc.shape
    C1 = params["w1"].shape[0]
    C2 = params["w2"].shape[0]
    Cin_p = _round_up(Cin, _LANE)
    C1_p = _round_up(C1, _LANE)
    C2_p = _round_up(C2, _LANE)

    tl_budget, vmem_limit = _pick_l_tile_and_vmem(Cin_p, C1_p, C2_p)
    if l_tile is not None:
        TL = max(16, _round_up(int(l_tile), 16))
    else:
        TL = max(16, min(tl_budget, _round_up(L, 16)))
    L_ceil = _round_up(L, TL)           # ragged L is padded up, never TL = L
    NT = L_ceil // TL
    R = TL + _HALO

    s1, b1 = _fold_bn(params["gamma1"], params["beta1"],
                      params["mean1"], params["var1"])
    s2, b2 = _fold_bn(params["gamma2"], params["beta2"],
                      params["mean2"], params["var2"])
    w1 = _prep_conv(params["w1"], Cin_p, C1_p)
    w2 = _prep_conv(params["w2"], C1_p, C2_p)
    s1, b1 = _prep_affine(s1, b1, C1_p)
    s2, b2 = _prep_affine(s2, b2, C2_p)

    # Channels -> lane multiple; L -> 2-row left halo + zero fill so every
    # R-row window [l*TL, l*TL+R) is in-bounds.  bf16 halves HBM/DMA bytes.
    # (Single pad/cast pass only — no overlapping-tile replication.)
    x_pad = jnp.pad(
        x_nlc,
        ((0, 0), (2, (L_ceil - L) + (_HALO - 2)), (0, Cin_p - Cin)),
    ).astype(jnp.bfloat16)

    kernel = functools.partial(_fused_conv_layer_kernel, L=L, TL=TL, NT=NT)

    out = pl.pallas_call(
        kernel,
        out_shape=jax.ShapeDtypeStruct((N, L_ceil, C2_p), out_dtype),
        grid_spec=pltpu.PrefetchScalarGridSpec(
            num_scalar_prefetch=0,
            grid=(N, NT),
            in_specs=[
                pl.BlockSpec(memory_space=pl.ANY),                   # x in HBM
                pl.BlockSpec((3 * Cin_p, C1_p), lambda n, l: (0, 0)),
                pl.BlockSpec((1, C1_p), lambda n, l: (0, 0)),
                pl.BlockSpec((1, C1_p), lambda n, l: (0, 0)),
                pl.BlockSpec((3 * C1_p, C2_p), lambda n, l: (0, 0)),
                pl.BlockSpec((1, C2_p), lambda n, l: (0, 0)),
                pl.BlockSpec((1, C2_p), lambda n, l: (0, 0)),
            ],
            out_specs=pl.BlockSpec((1, TL, C2_p), lambda n, l: (n, l, 0)),
            scratch_shapes=[
                pltpu.VMEM((2, R, Cin_p), jnp.bfloat16),   # x double buffer
                pltpu.SemaphoreType.DMA((2,)),
            ],
        ),
        compiler_params=pltpu.CompilerParams(
            # N shards across TensorCores; the L-tile axis must run in order
            # within a core (manual prefetch chain), hence "arbitrary".
            dimension_semantics=("parallel", "arbitrary"),
            vmem_limit_bytes=vmem_limit,
        ),
    )(x_pad, w1, s1, b1, w2, s2, b2)

    if trim:
        return out[:, :L, :C2]
    return out[:, :L, :]


def conv_layer_forward(x_ncl, params, *, out_dtype=jnp.bfloat16, l_tile=None):
    """ConvLayer forward with PyTorch layout: (N, Cin, L) -> (N, Cout, L).

    The transposes exist only to match the NCL interface; a channels-last model
    should call conv_layer_forward_nlc directly (no layout passes, optional
    trim=False to also skip the channel-slice pass).
    """
    x = jnp.transpose(x_ncl, (0, 2, 1))
    y = conv_layer_forward_nlc(x, params, out_dtype=out_dtype, l_tile=l_tile)
    return jnp.transpose(y, (0, 2, 1))


# ---------------------------------------------------------------------------
# plain-JAX reference (f32, lax.conv) for verification
# ---------------------------------------------------------------------------
def _reference_forward(x_ncl, params):
    def block(x, w, gamma, beta, mean, var, eps=1e-5):
        y = lax.conv_general_dilated(
            x, w, window_strides=(1,), padding=((1, 1),),
            dimension_numbers=("NCH", "OIH", "NCH"))
        s = (gamma / jnp.sqrt(var + eps))[None, :, None]
        b = (beta - mean * gamma / jnp.sqrt(var + eps))[None, :, None]
        return jnp.maximum(y * s + b, 0.0)

    y = block(x_ncl, params["w1"], params["gamma1"], params["beta1"],
              params["mean1"], params["var1"])
    y = block(y, params["w2"], params["gamma2"], params["beta2"],
              params["mean2"], params["var2"])
    return y


if __name__ == "__main__":
    N, C_in, C_out = 2, 4, 8
    key = jax.random.PRNGKey(0)
    ks = jax.random.split(key, 10)

    params = {
        "w1": jax.random.normal(ks[0], (C_out, C_in, 3), jnp.float32) * 0.2,
        "gamma1": 1.0 + 0.1 * jax.random.normal(ks[1], (C_out,), jnp.float32),
        "beta1": 0.1 * jax.random.normal(ks[2], (C_out,), jnp.float32),
        "mean1": 0.1 * jax.random.normal(ks[3], (C_out,), jnp.float32),
        "var1": jnp.abs(jax.random.normal(ks[4], (C_out,), jnp.float32)) + 0.5,
        "w2": jax.random.normal(ks[5], (C_out, C_out, 3), jnp.float32) * 0.2,
        "gamma2": 1.0 + 0.1 * jax.random.normal(ks[6], (C_out,), jnp.float32),
        "beta2": 0.1 * jax.random.normal(ks[7], (C_out,), jnp.float32),
        "mean2": jnp.zeros((C_out,), jnp.float32),
        "var2": jnp.ones((C_out,), jnp.float32),
    }

    # test 1: single L-tile (L=16), auto TL
    x = jax.random.normal(ks[8], (N, C_in, 16), jnp.float32)
    out = jax.block_until_ready(conv_layer_forward(x, params))
    ref = _reference_forward(x, params)
    assert out.shape == (N, C_out, 16)
    # bf16 MXU inputs + bf16 output -> looser tolerance than pure-f32 reference.
    assert jnp.allclose(out.astype(jnp.float32), ref, atol=5e-2, rtol=5e-2), \
        float(jnp.max(jnp.abs(out.astype(jnp.float32) - ref)))

    # test 2: ragged L with multiple L-tiles (L=40, TL=16 -> 3 tiles):
    # exercises halo, position masking, L padding, and the DMA prefetch chain.
    x2 = jax.random.normal(ks[9], (N, C_in, 40), jnp.float32)
    out2 = jax.block_until_ready(conv_layer_forward(x2, params, l_tile=16))
    ref2 = _reference_forward(x2, params)
    assert out2.shape == (N, C_out, 40)
    assert jnp.allclose(out2.astype(jnp.float32), ref2, atol=5e-2, rtol=5e-2), \
        float(jnp.max(jnp.abs(out2.astype(jnp.float32) - ref2)))

    print("KERNEL_OK")
</pallas_src>

<mosaic_0001>
module attributes {stable_mosaic.version = 11 : i64} {
  func.func @probe(%arg0: memref<16x128xbf16, #tpu.memory_space<vmem>>, %arg1: memref<16x128xbf16, #tpu.memory_space<vmem>>) attributes {dimension_semantics = [], scalar_prefetch = 0 : i64, scratch_operands = 0 : i64, tpu.core_type = #tpu.core_type<tc>} {
    %c0 = arith.constant 0 : index
    %c0_0 = arith.constant 0 : index
    %0 = vector.load %arg0[%c0, %c0_0] : memref<16x128xbf16, #tpu.memory_space<vmem>>, vector<16x128xbf16>
    %c1_i32 = arith.constant 1 : i32
    %1 = tpu.dynamic_rotate %0 by %c1_i32 dim 0 : vector<16x128xbf16>, i32 -> vector<16x128xbf16>
    %c0_1 = arith.constant 0 : index
    %c0_2 = arith.constant 0 : index
    %2 = vector.load %arg1[%c0_1, %c0_2] : memref<16x128xbf16, #tpu.memory_space<vmem>>, vector<16x128xbf16>
    tpu.vector_store %arg1[%c0_1, %c0_2], %1 {strides = array<i32>} : memref<16x128xbf16, #tpu.memory_space<vmem>>, vector<16x128xbf16>,
    return
  }
}

module attributes {stable_mosaic.version = 11 : i64} {
  func.func @_fused_conv_layer_kernel(%arg0: i32, %arg1: i32, %arg2: memref<2x32x128xbf16, #tpu.memory_space<any>>, %arg3: memref<384x128xbf16, #tpu.memory_space<vmem>>, %arg4: memref<1x128xf32, #tpu.memory_space<vmem>>, %arg5: memref<1x128xf32, #tpu.memory_space<vmem>>, %arg6: memref<384x128xbf16, #tpu.memory_space<vmem>>, %arg7: memref<1x128xf32, #tpu.memory_space<vmem>>, %arg8: memref<1x128xf32, #tpu.memory_space<vmem>>, %arg9: memref<1x16x128xbf16, #tpu.memory_space<vmem>>, %arg10: memref<2x32x128xbf16, #tpu.memory_space<vmem>>, %arg11: memref<2x!tpu.dma_semaphore, #tpu.memory_space<semaphore_mem>>) attributes {dimension_semantics = [#tpu.dimension_semantics<parallel>, #tpu.dimension_semantics<arbitrary>], iteration_bounds = array<i64: 2, 1>, scalar_prefetch = 0 : i64, scratch_operands = 2 : i64, tpu.core_type = #tpu.core_type<tc>, window_params = [{}, {pipeline_mode = #tpu.pipeline_mode<synchronous>, transform_indices = @transform_1, window_bounds = array<i64: 384, 128>}, {pipeline_mode = #tpu.pipeline_mode<synchronous>, transform_indices = @transform_2, window_bounds = array<i64: 1, 128>}, {pipeline_mode = #tpu.pipeline_mode<synchronous>, transform_indices = @transform_3, window_bounds = array<i64: 1, 128>}, {pipeline_mode = #tpu.pipeline_mode<synchronous>, transform_indices = @transform_4, window_bounds = array<i64: 384, 128>}, {pipeline_mode = #tpu.pipeline_mode<synchronous>, transform_indices = @transform_5, window_bounds = array<i64: 1, 128>}, {pipeline_mode = #tpu.pipeline_mode<synchronous>, transform_indices = @transform_6, window_bounds = array<i64: 1, 128>}, {transform_indices = @transform_7, window_bounds = array<i64: 1, 16, 128>}]} {
    %c2_i32 = arith.constant 2 : i32
    %0 = arith.remsi %arg1, %c2_i32 : i32
    %c0_i32 = arith.constant 0 : i32
    %1 = arith.cmpi eq, %arg1, %c0_i32 : i32
    %2 = arith.extui %1 : i1 to i32
    %c0_i32_0 = arith.constant 0 : i32
    %3 = arith.cmpi ne, %2, %c0_i32_0 : i32
    scf.if %3 {
      %c16_i32_30 = arith.constant 16 : i32
      %73 = arith.muli %arg1, %c16_i32_30 : i32
      %74 = tpu.assume_multiple %73, 16 : i32
      %c0_i32_31 = arith.constant 0 : i32
      %75 = tpu.memref_slice %arg2[%arg0, %74, %c0_i32_31] : memref<2x32x128xbf16, #tpu.memory_space<any>> -> memref<1x32x128xbf16, #tpu.memory_space<any>>
      %76 = tpu.memref_squeeze %75 : memref<1x32x128xbf16, #tpu.memory_space<any>> -> memref<32x128xbf16, #tpu.memory_space<any>>
      %c0_i32_32 = arith.constant 0 : i32
      %c0_i32_33 = arith.constant 0 : i32
      %77 = tpu.memref_slice %arg10[%0, %c0_i32_32, %c0_i32_33] : memref<2x32x128xbf16, #tpu.memory_space<vmem>> -> memref<1x32x128xbf16, #tpu.memory_space<vmem>>
      %78 = tpu.memref_squeeze %77 : memref<1x32x128xbf16, #tpu.memory_space<vmem>> -> memref<32x128xbf16, #tpu.memory_space<vmem>>
      %79 = tpu.memref_slice %arg11[%0] : memref<2x!tpu.dma_semaphore, #tpu.memory_space<semaphore_mem>> -> memref<1x!tpu.dma_semaphore, #tpu.memory_space<semaphore_mem>>
      %80 = tpu.memref_squeeze %79 : memref<1x!tpu.dma_semaphore, #tpu.memory_space<semaphore_mem>> -> memref<!tpu.dma_semaphore, #tpu.memory_space<semaphore_mem>>
      tpu.enqueue_dma source(%76 : memref<32x128xbf16, #tpu.memory_space<any>>) target(%78 : memref<32x128xbf16, #tpu.memory_space<vmem>>) target_semaphore(%80 : memref<!tpu.dma_semaphore, #tpu.memory_space<semaphore_mem>>)
    } else {
    }
    %c1_i32 = arith.constant 1 : i32
    %4 = arith.addi %arg1, %c1_i32 : i32
    %c1_i32_1 = arith.constant 1 : i32
    %5 = arith.cmpi slt, %4, %c1_i32_1 : i32
    %6 = arith.extui %5 : i1 to i32
    %c0_i32_2 = arith.constant 0 : i32
    %7 = arith.cmpi ne, %6, %c0_i32_2 : i32
    scf.if %7 {
      %c1_i32_30 = arith.constant 1 : i32
      %73 = arith.addi %arg1, %c1_i32_30 : i32
      %c1_i32_31 = arith.constant 1 : i32
      %74 = arith.subi %c1_i32_31, %0 : i32
      %c16_i32_32 = arith.constant 16 : i32
      %75 = arith.muli %73, %c16_i32_32 : i32
      %76 = tpu.assume_multiple %75, 16 : i32
      %c0_i32_33 = arith.constant 0 : i32
      %77 = tpu.memref_slice %arg2[%arg0, %76, %c0_i32_33] : memref<2x32x128xbf16, #tpu.memory_space<any>> -> memref<1x32x128xbf16, #tpu.memory_space<any>>
      %78 = tpu.memref_squeeze %77 : memref<1x32x128xbf16, #tpu.memory_space<any>> -> memref<32x128xbf16, #tpu.memory_space<any>>
      %c0_i32_34 = arith.constant 0 : i32
      %c0_i32_35 = arith.constant 0 : i32
      %79 = tpu.memref_slice %arg10[%74, %c0_i32_34, %c0_i32_35] : memref<2x32x128xbf16, #tpu.memory_space<vmem>> -> memref<1x32x128xbf16, #tpu.memory_space<vmem>>
      %80 = tpu.memref_squeeze %79 : memref<1x32x128xbf16, #tpu.memory_space<vmem>> -> memref<32x128xbf16, #tpu.memory_space<vmem>>
      %81 = tpu.memref_slice %arg11[%74] : memref<2x!tpu.dma_semaphore, #tpu.memory_space<semaphore_mem>> -> memref<1x!tpu.dma_semaphore, #tpu.memory_space<semaphore_mem>>
      %82 = tpu.memref_squeeze %81 : memref<1x!tpu.dma_semaphore, #tpu.memory_space<semaphore_mem>> -> memref<!tpu.dma_semaphore, #tpu.memory_space<semaphore_mem>>
      tpu.enqueue_dma source(%78 : memref<32x128xbf16, #tpu.memory_space<any>>) target(%80 : memref<32x128xbf16, #tpu.memory_space<vmem>>) target_semaphore(%82 : memref<!tpu.dma_semaphore, #tpu.memory_space<semaphore_mem>>)
    } else {
    }
    %c16_i32 = arith.constant 16 : i32
    %8 = arith.muli %arg1, %c16_i32 : i32
    %9 = tpu.assume_multiple %8, 16 : i32
    %c0_i32_3 = arith.constant 0 : i32
    %10 = tpu.memref_slice %arg2[%arg0, %9, %c0_i32_3] : memref<2x32x128xbf16, #tpu.memory_space<any>> -> memref<1x32x128xbf16, #tpu.memory_space<any>>
    %11 = tpu.memref_squeeze %10 : memref<1x32x128xbf16, #tpu.memory_space<any>> -> memref<32x128xbf16, #tpu.memory_space<any>>
    %c0_i32_4 = arith.constant 0 : i32
    %c0_i32_5 = arith.constant 0 : i32
    %12 = tpu.memref_slice %arg10[%0, %c0_i32_4, %c0_i32_5] : memref<2x32x128xbf16, #tpu.memory_space<vmem>> -> memref<1x32x128xbf16, #tpu.memory_space<vmem>>
    %13 = tpu.memref_squeeze %12 : memref<1x32x128xbf16, #tpu.memory_space<vmem>> -> memref<32x128xbf16, #tpu.memory_space<vmem>>
    %14 = tpu.memref_slice %arg11[%0] : memref<2x!tpu.dma_semaphore, #tpu.memory_space<semaphore_mem>> -> memref<1x!tpu.dma_semaphore, #tpu.memory_space<semaphore_mem>>
    %15 = tpu.memref_squeeze %14 : memref<1x!tpu.dma_semaphore, #tpu.memory_space<semaphore_mem>> -> memref<!tpu.dma_semaphore, #tpu.memory_space<semaphore_mem>>
    tpu.wait_dma2 semaphore(%15 : memref<!tpu.dma_semaphore, #tpu.memory_space<semaphore_mem>>) src(%11 : memref<32x128xbf16, #tpu.memory_space<any>>) dst(%13 : memref<32x128xbf16, #tpu.memory_space<vmem>>)
    %16 = arith.index_cast %0 : i32 to index
    %c0 = arith.constant 0 : index
    %c0_6 = arith.constant 0 : index
    %17 = vector.load %arg10[%16, %c0, %c0_6] : memref<2x32x128xbf16, #tpu.memory_space<vmem>>, vector<1x32x128xbf16>
    %18 = vector.shape_cast %17 : vector<1x32x128xbf16> to vector<32x128xbf16>
    %19 = vector.extract_strided_slice %18 {offsets = [1, 0], sizes = [31, 128], strides = [1, 1]} : vector<32x128xbf16> to vector<31x128xbf16>
    %20 = vector.extract_strided_slice %18 {offsets = [0, 0], sizes = [1, 128], strides = [1, 1]} : vector<32x128xbf16> to vector<1x128xbf16>
    %21 = tpu.concatenate %19, %20 in 0 : vector<31x128xbf16>, vector<1x128xbf16> -> vector<32x128xbf16>
    %22 = vector.extract_strided_slice %18 {offsets = [2, 0], sizes = [30, 128], strides = [1, 1]} : vector<32x128xbf16> to vector<30x128xbf16>
    %23 = vector.extract_strided_slice %18 {offsets = [0, 0], sizes = [2, 128], strides = [1, 1]} : vector<32x128xbf16> to vector<2x128xbf16>
    %24 = tpu.concatenate %22, %23 in 0 : vector<30x128xbf16>, vector<2x128xbf16> -> vector<32x128xbf16>
    %25 = tpu.concatenate %18, %21, %24 in 1 : vector<32x128xbf16>, vector<32x128xbf16>, vector<32x128xbf16> -> vector<32x384xbf16>
    %c0_7 = arith.constant 0 : index
    %c0_8 = arith.constant 0 : index
    %26 = vector.load %arg3[%c0_7, %c0_8] : memref<384x128xbf16, #tpu.memory_space<vmem>>, vector<384x128xbf16>
    %cst = arith.constant dense<0.000000e+00> : vector<32x128xf32>
    %27 = tpu.matmul %25, %26, %cst {dimension_numbers = #tpu.dot_dimension_numbers<[1], [0], [0], [1], [0, 0, 1, 1], [], []>} : vector<32x384xbf16>, vector<384x128xbf16>, vector<32x128xf32> -> vector<32x128xf32>
    %c0_9 = arith.constant 0 : index
    %c0_10 = arith.constant 0 : index
    %28 = vector.load %arg4[%c0_9, %c0_10] : memref<1x128xf32, #tpu.memory_space<vmem>>, vector<1x128xf32>
    %29 = vector.broadcast %28 : vector<1x128xf32> to vector<32x128xf32>
    %30 = arith.mulf %27, %29 : vector<32x128xf32>
    %c0_11 = arith.constant 0 : index
    %c0_12 = arith.constant 0 : index
    %31 = vector.load %arg5[%c0_11, %c0_12] : memref<1x128xf32, #tpu.memory_space<vmem>>, vector<1x128xf32>
    %32 = vector.broadcast %31 : vector<1x128xf32> to vector<32x128xf32>
    %33 = arith.addf %30, %32 : vector<32x128xf32>
    %cst_13 = arith.constant 0.000000e+00 : f32
    %34 = vector.broadcast %cst_13 : f32 to vector<32x128xf32>
    %35 = arith.maximumf %33, %34 : vector<32x128xf32>
    %c16_i32_14 = arith.constant 16 : i32
    %36 = arith.muli %arg1, %c16_i32_14 : i32
    %c1_i32_15 = arith.constant 1 : i32
    %37 = arith.subi %36, %c1_i32_15 : i32
    %38 = tpu.iota {dimensions = array<i32: 0>} : vector<32x1xi32>
    %39 = vector.broadcast %37 : i32 to vector<32x1xi32>
    %40 = arith.addi %39, %38 : vector<32x1xi32>
    %c0_i32_16 = arith.constant 0 : i32
    %41 = vector.broadcast %c0_i32_16 : i32 to vector<32x1xi32>
    %42 = arith.cmpi sge, %40, %41 : vector<32x1xi32>
    %c16_i32_17 = arith.constant 16 : i32
    %43 = vector.broadcast %c16_i32_17 : i32 to vector<32x1xi32>
    %44 = arith.cmpi slt, %40, %43 : vector<32x1xi32>
    %45 = arith.andi %42, %44 : vector<32x1xi1>
    %cst_18 = arith.constant 0.000000e+00 : f32
    %46 = vector.shape_cast %45 : vector<32x1xi1> to vector<32x1xi1>
    %47 = vector.broadcast %46 : vector<32x1xi1> to vector<32x128xi1>
    %48 = vector.broadcast %cst_18 : f32 to vector<32x128xf32>
    %49 = arith.select %47, %35, %48 : vector<32x128xi1>, vector<32x128xf32>
    %50 = arith.truncf %49 : vector<32x128xf32> to vector<32x128xbf16>
    %51 = vector.extract_strided_slice %50 {offsets = [1, 0], sizes = [31, 128], strides = [1, 1]} : vector<32x128xbf16> to vector<31x128xbf16>
    %52 = vector.extract_strided_slice %50 {offsets = [0, 0], sizes = [1, 128], strides = [1, 1]} : vector<32x128xbf16> to vector<1x128xbf16>
    %53 = tpu.concatenate %51, %52 in 0 : vector<31x128xbf16>, vector<1x128xbf16> -> vector<32x128xbf16>
    %54 = vector.extract_strided_slice %50 {offsets = [2, 0], sizes = [30, 128], strides = [1, 1]} : vector<32x128xbf16> to vector<30x128xbf16>
    %55 = vector.extract_strided_slice %50 {offsets = [0, 0], sizes = [2, 128], strides = [1, 1]} : vector<32x128xbf16> to vector<2x128xbf16>
    %56 = tpu.concatenate %54, %55 in 0 : vector<30x128xbf16>, vector<2x128xbf16> -> vector<32x128xbf16>
    %57 = tpu.concatenate %50, %53, %56 in 1 : vector<32x128xbf16>, vector<32x128xbf16>, vector<32x128xbf16> -> vector<32x384xbf16>
    %c0_19 = arith.constant 0 : index
    %c0_20 = arith.constant 0 : index
    %58 = vector.load %arg6[%c0_19, %c0_20] : memref<384x128xbf16, #tpu.memory_space<vmem>>, vector<384x128xbf16>
    %cst_21 = arith.constant dense<0.000000e+00> : vector<32x128xf32>
    %59 = tpu.matmul %57, %58, %cst_21 {dimension_numbers = #tpu.dot_dimension_numbers<[1], [0], [0], [1], [0, 0, 1, 1], [], []>} : vector<32x384xbf16>, vector<384x128xbf16>, vector<32x128xf32> -> vector<32x128xf32>
    %c0_22 = arith.constant 0 : index
    %c0_23 = arith.constant 0 : index
    %60 = vector.load %arg7[%c0_22, %c0_23] : memref<1x128xf32, #tpu.memory_space<vmem>>, vector<1x128xf32>
    %61 = vector.broadcast %60 : vector<1x128xf32> to vector<32x128xf32>
    %62 = arith.mulf %59, %61 : vector<32x128xf32>
    %c0_24 = arith.constant 0 : index
    %c0_25 = arith.constant 0 : index
    %63 = vector.load %arg8[%c0_24, %c0_25] : memref<1x128xf32, #tpu.memory_space<vmem>>, vector<1x128xf32>
    %64 = vector.broadcast %63 : vector<1x128xf32> to vector<32x128xf32>
    %65 = arith.addf %62, %64 : vector<32x128xf32>
    %cst_26 = arith.constant 0.000000e+00 : f32
    %66 = vector.broadcast %cst_26 : f32 to vector<32x128xf32>
    %67 = arith.maximumf %65, %66 : vector<32x128xf32>
    %68 = vector.extract_strided_slice %67 {offsets = [0, 0], sizes = [16, 128], strides = [1, 1]} : vector<32x128xf32> to vector<16x128xf32>
    %69 = arith.truncf %68 : vector<16x128xf32> to vector<16x128xbf16>
    %c0_27 = arith.constant 0 : index
    %c0_28 = arith.constant 0 : index
    %c0_29 = arith.constant 0 : index
    %70 = vector.load %arg9[%c0_27, %c0_28, %c0_29] : memref<1x16x128xbf16, #tpu.memory_space<vmem>>, vector<1x16x128xbf16>
    %71 = vector.shape_cast %70 : vector<1x16x128xbf16> to vector<16x128xbf16>
    %72 = vector.shape_cast %69 : vector<16x128xbf16> to vector<1x16x128xbf16>
    tpu.vector_store %arg9[%c0_27, %c0_28, %c0_29], %72 {strides = array<i32>} : memref<1x16x128xbf16, #tpu.memory_space<vmem>>, vector<1x16x128xbf16>,
    return
  }
  func.func @transform_1(%arg0: i32, %arg1: i32) -> (i32, i32) {
    %c0_i32 = arith.constant 0 : i32
    %c0_i32_0 = arith.constant 0 : i32
    %c0_i32_1 = arith.constant 0 : i32
    return %c0_i32, %c0_i32_0 : i32, i32
  }
  func.func @transform_2(%arg0: i32, %arg1: i32) -> (i32, i32) {
    %c0_i32 = arith.constant 0 : i32
    %c0_i32_0 = arith.constant 0 : i32
    %c0_i32_1 = arith.constant 0 : i32
    return %c0_i32, %c0_i32_0 : i32, i32
  }
  func.func @transform_3(%arg0: i32, %arg1: i32) -> (i32, i32) {
    %c0_i32 = arith.constant 0 : i32
    %c0_i32_0 = arith.constant 0 : i32
    %c0_i32_1 = arith.constant 0 : i32
    return %c0_i32, %c0_i32_0 : i32, i32
  }
  func.func @transform_4(%arg0: i32, %arg1: i32) -> (i32, i32) {
    %c0_i32 = arith.constant 0 : i32
    %c0_i32_0 = arith.constant 0 : i32
    %c0_i32_1 = arith.constant 0 : i32
    return %c0_i32, %c0_i32_0 : i32, i32
  }
  func.func @transform_5(%arg0: i32, %arg1: i32) -> (i32, i32) {
    %c0_i32 = arith.constant 0 : i32
    %c0_i32_0 = arith.constant 0 : i32
    %c0_i32_1 = arith.constant 0 : i32
    return %c0_i32, %c0_i32_0 : i32, i32
  }
  func.func @transform_6(%arg0: i32, %arg1: i32) -> (i32, i32) {
    %c0_i32 = arith.constant 0 : i32
    %c0_i32_0 = arith.constant 0 : i32
    %c0_i32_1 = arith.constant 0 : i32
    return %c0_i32, %c0_i32_0 : i32, i32
  }
  func.func @transform_7(%arg0: i32, %arg1: i32) -> (i32, i32, i32) {
    %c0_i32 = arith.constant 0 : i32
    %c0_i32_0 = arith.constant 0 : i32
    return %arg0, %arg1, %c0_i32 : i32, i32, i32
  }
}

</mosaic_0001>

<bundles_post_ra>
// kernel: tpu_custom_call.1
= control target key start
LH: loop header
LB: loop body
LE: loop exit
PB: predicated region body
PF: predicated region fallthrough
CT: control target
= control target key end

     0   :  { %12 = vsyncpa [#allocation5], 0  ;;  %s2004_s0 = inlined_call_operand.hbm [shape: bf16[2,32,128], index: 0, kind: input, shape index: {}]   ;;  %s2005_s1 = inlined_call_operand.hbm [shape: bf16[384,128], index: 1, kind: input, shape index: {}]   ;;  %s2006_s2 = inlined_call_operand.vmem [shape: f32[1,128], index: 2, kind: input, shape index: {}]   ;;  %s2007_s3 = inlined_call_operand.vmem [shape: f32[1,128], index: 3, kind: input, shape index: {}]   ;;  %s2008_s4 = inlined_call_operand.hbm [shape: bf16[384,128], index: 4, kind: input, shape index: {}]   ;;  %s2009_s5 = inlined_call_operand.vmem [shape: f32[1,128], index: 5, kind: input, shape index: {}]   ;;  %s2010_s6 = inlined_call_operand.vmem [shape: f32[1,128], index: 6, kind: input, shape index: {}]   ;;  %s2011_s7 = inlined_call_operand.hbm [shape: bf16[2,16,128], index: 7, kind: output, shape index: {}]  }
   0x1   :  { %13 = vsyncpa [#allocation8], 0 }
   0x2   :  { %14 = vsyncpa [#allocation6], 0 }
   0x3   :  { %16 = vsyncpa [#allocation6 + $0x1], 0  ;;  %s1767_s24 = smov 0   ;;  %s1769_s25 = smov 0  }
   0x4   :  { %s1771_s26 = smov 0   ;;  %s1773_s27 = smov 0  }
   0x5   :  { %s1775_s28 = smov 0   ;;  %s1777_s29 = smov 0  }
   0x6 LB: > { %2018 = sst [smem:[#allocation20_spill]] %s1711_s28  ;;  %s1209_s30 = sadd.s32 4294967295, %s1715_s29   ;;  %s1715_s29 = sphi %s1777_s29, %s22_s29   ;;  %s1711_s28 = sphi %s1775_s28, %s2034_s28   ;;  %s1707_s27 = sphi %s1773_s27, %s2033_s27   ;;  %s1703_s26 = sphi %s1771_s26, %s2037_s26   ;;  %s1699_s25 = sphi %s1769_s25, %s2036_s25   ;;  %s1695_s24 = sphi %s1767_s24, %s2035_s24  }
   0x7   : > { %s1210_s8 = sadd.s32 4294967294, %s1715_s29   ;;  %s34_s9 = sadd.s32 1, %s1711_s28 }
   0x8   : > { %s169_s10 = sadd.s32 1, %s1703_s26  ;;  %p36_p0 = scmp.ge.s32.totalorder %s34_s9, 2 }
   0x9   : > { %p179_p1 = scmp.ne.s32.totalorder %s1703_s26, %s1699_s25  ;;  %p180_p2 = scmp.eq.s32.totalorder %s1209_s30, 1 }
   0xa   : > { %p185_p3 = scmp.ne.s32.totalorder %s1699_s25, %s1695_s24  ;;  %s2039_s9 = smov (%p36_p0, %s34_s9), 0 }
   0xb   : > { %2019 = sst [smem:[#allocation21_spill]] %s2039_s9  ;;  %p1807_p4 = por %p180_p2, %p179_p1 }
   0xc   : > { %p186_p5 = scmp.eq.s32.totalorder %s1210_s8, 1  ;;  %s164_s12 = ssub.s32 %s1711_s28, %s2039_s9 }
   0xd   : > { %s2020_s11 = scalar_select %p1807_p4, 1, 0 }
   0xe   : > { %p1211_p6 = scmp.ge.s32.totalorder %s1715_s29, 1  ;;  %p167_p7 = scmp.eq.s32.totalorder %s164_s12, 0 }
   0xf   : > { %p1814_p8 = por %p186_p5, %p185_p3  ;;  %p193_p9 = scmp.lt.s32.totalorder %s1715_s29, 3 }
  0x10   : > { %s1820_s14 = scalar_select %p167_p7, %s1703_s26, %s169_s10  }
  0x11   : > { %s2021_s13 = scalar_select %p1814_p8, 1, 0 }
  0x12   : > { %2022 = sst [smem:[#allocation22_spill]] %s1820_s14  ;;  %p1822_p10 = pnand %p1211_p6, %p193_p9 }
  0x13   : > { %p1826_p11 = scmp.eq.s32.totalorder %s1209_s30, 0  ;;  %s1717_s17 = smov [#allocation4]  }
  0x14   : > { %s2023_s15 = scalar_select %p1822_p10, 1, 0 }
  0x15   : > { %s2024_s16 = scalar_select %p1826_p11, 1, 0 }
  0x16   : > { %p1426_p12 = pneg %p1822_p10  ;;  %s205_s18 = sshll.u32 %s1717_s17, 4  ;;  %s206_s18 = int_to_ptr.vmem [resolvable:$true] %s205_s18 }
  0x17   : > { %s1718_s20 = smov [#allocation7]   ;;  %s1547_s30 = scalar_lea.hbm %s2005_s1, 3072 }
  0x18   : > { %p1834_p13 = pnand %p1826_p11, %p1426_p12  ;;  %s224_s21 = sshll.u32 %s1718_s20, 4  ;;  %s1838_s21 = int_to_ptr.vmem [resolvable:$true] %s224_s21 }
  0x19   : > { %p1548_p0 = scmp.ne.s32.totalorder %s2005_s1, %s1547_s30  ;;  %p1554_p5 = scmp.lt.u32.totalorder %s1547_s30, %s2005_s1 }
  0x1a   : > { %p1549_p1 = pneg %p1834_p13 }
  0x1c   : > { %p1550_p2 = pnand %p1549_p1, %p1548_p0 }
  0x1e   : > { %p1551_p3 = pneg %p1550_p2 }
  0x20   : > { %p1556_p6 = pnand %p1554_p5, %p1551_p3 }
  0x22   : > { %1559 = shalt.err (!%p1556_p6)
}
  0x23   : > { %s1560_s20 = scalar_lea.vmem %s206_s18, 3072  ;;  %p1568_p8 = scmp.lt.s32.totalorder %s206_s18, %s206_s18 }
  0x24   : > { %p1561_p7 = scmp.ne.s32.totalorder %s206_s18, %s1560_s20  ;;  %p1569_p4 = scmp.lt.s32.totalorder %s1560_s20, %s1560_s20 }
  0x26   : > { %p1563_p9 = pnand %p1561_p7, %p1549_p1  ;;  %p1570_p11 = por %p1569_p4, %p1568_p8 }
  0x28   : > { %p1564_p12 = pneg %p1563_p9 }
  0x2a   : > { %p1571_p10 = pnand %p1570_p11, %p1564_p12 }
  0x2c   : > { %1574 = shalt.err (!%p1571_p10)
}
  0x2d   : > { %s1719_s22 = smov 64   ;;  %s1720_s23 = smov 4  }
  0x2e   : > { %1429 = dma.hbm_to_vmem [thread:$0]  (!%p1834_p13), %s2005_s1, 3072, %s206_s18, [#allocation5], %s1719_s22, %s1719_s22, %s1720_s23  }
  0x2f   : > { %s1575_s17 = scalar_lea.hbm %s2008_s4, 3072 }
  0x30   : > { %p1576_p0 = scmp.ne.s32.totalorder %s2008_s4, %s1575_s17  ;;  %p1582_p10 = scmp.lt.u32.totalorder %s1575_s17, %s2008_s4 }
  0x32   : > { %p1578_p4 = pnand %p1576_p0, %p1549_p1 }
  0x34   : > { %p1579_p8 = pneg %p1578_p4 }
  0x36   : > { %p1584_p11 = pnand %p1582_p10, %p1579_p8 }
  0x38   : > { %1587 = shalt.err (!%p1584_p11)
}
  0x39   : > { %s1588_s18 = scalar_lea.vmem %s1838_s21, 3072  ;;  %p1596_p6 = scmp.lt.s32.totalorder %s1838_s21, %s1838_s21 }
  0x3a   : > { %p1589_p2 = scmp.ne.s32.totalorder %s1838_s21, %s1588_s18  ;;  %p1597_p7 = scmp.lt.s32.totalorder %s1588_s18, %s1588_s18 }
  0x3c   : > { %p1591_p3 = pnand %p1589_p2, %p1549_p1  ;;  %p1598_p9 = por %p1597_p7, %p1596_p6 }
  0x3e   : > { %p1592_p5 = pneg %p1591_p3 }
  0x40   : > { %p1599_p12 = pnand %p1598_p9, %p1592_p5 }
  0x42   : > { %1602 = shalt.err (!%p1599_p12)
}
  0x43   : > { %1432 = dma.hbm_to_vmem [thread:$0]  (!%p1834_p13), %s2008_s4, 3072, %s1838_s21, [#allocation8], %s1719_s22, %s1719_s22, %s1720_s23  }
  0x44   : > { %p2026_p0 = scmp.ne.s32.totalorder %s2023_s15, 0 }
  0x45   : > { %p2027_p4 = scmp.ne.s32.totalorder (!%p2026_p0), %s2024_s16, 0 }
  0x46   : > { %246 = sbr.rel (%p2026_p0) target bundleno = 621 (0x26d), region = 44 }
  0x4d   : > { %1680 = dma.done.wait (%p2027_p4), [#allocation5], 3072  }
  0x4e   : > { %1682 = vsyncadd (%p2027_p4), [#allocation5], 4294964224 }
  0x4f   : > { %1684 = dma.done.wait (%p2027_p4), [#allocation8], 3072  }
  0x50   : > { %1686 = vsyncadd (%p2027_p4), [#allocation8], 4294964224  ;;  %s272_s14 = sand.u32 1, %s1699_s25   ;;  %s1289_s19 = sshll.u32 %s1707_s27, 8 }
  0x51   : > { %s1901_s15 = sshll.u32 %s272_s14, 3  ;;  %s293_s23 = scalar_lea.hbm %s2004_s0, %s1289_s19 }
  0x52   : > { %s1721_s30 = smov [#allocation2]   ;;  %s1603_s10 = scalar_lea.hbm %s293_s23, 256 }
  0x53   : > { %s305_s8 = sshll.u32 %s1721_s30, 4  ;;  %p1604_p13 = scmp.ne.s32.totalorder %s293_s23, %s1603_s10  ;;  %s306_s8 = int_to_ptr.vmem [resolvable:$true] %s305_s8 }
  0x54   : > { %s1605_s17 = scalar_lea.hbm %s2004_s0, 512  ;;  %p1606_p1 = scmp.lt.u32.totalorder %s293_s23, %s2004_s0 }
  0x55   : > { %p1607_p8 = scmp.lt.u32.totalorder %s1605_s17, %s1603_s10  ;;  %p1609_p11 = scmp.lt.u32.totalorder %s1603_s10, %s293_s23 }
  0x57   : > { %p1608_p10 = por %p1607_p8, %p1606_p1 }
  0x59   : > { %p1610_p2 = por %p1609_p11, %p1608_p10 }
  0x5b   : > { %p1611_p3 = pnand %p1610_p2, %p1604_p13 }
  0x5d   : > { %1614 = shalt.err (!%p1611_p3)  }
  0x5e   : > { %s1615_s28 = scalar_lea.vmem %s306_s8, 256  ;;  %s1619_s9 = scalar_lea.vmem %s306_s8, 512 }
  0x5f   : > { %p1616_p5 = scmp.ne.s32.totalorder %s306_s8, %s1615_s28  ;;  %p1620_p6 = scmp.lt.s32.totalorder %s306_s8, %s306_s8 }
  0x60   : > { %p1621_p7 = scmp.lt.s32.totalorder %s1619_s9, %s1615_s28 }
  0x62   : > { %p1622_p9 = por %p1621_p7, %p1620_p6 }
  0x64   : > { %p1623_p12 = pnand %p1622_p9, %p1616_p5 }
  0x66   : > { %1626 = shalt.err (!%p1623_p12)  }
  0x67   : > { %308 = dma.hbm_to_vmem [thread:$0]  %s293_s23, 256, %s306_s8, [#allocation3] }
  0x68   : > { %s274_s19 = scalar_lea.vmem [#allocation9], %s1901_s15 }
  0x69   : > { %1687 = dma.done.wait [#allocation3], 256 }
  0x6a   : > { %1688 = vsyncadd [#allocation3], 4294967040  ;;  %v1499_v0 = vld [vmem:[#allocation4 + $0x40] sm:$0xff]   ;;  %v1502_v3 = vld [vmem:[#allocation4 + $0x48] sm:$0xff]   ;;  %vm348_vm0 = vsmask.f32 7424 }
  0x6b   : > { %v1500_v1 = vld [vmem:[#allocation4] sm:$0xff]   ;;  %1300 = vmatprep.subr.bf16.mxu0 %v1499_v0  ;;  %v1503_v4 = vld [vmem:[#allocation4 + $0x8] sm:$0xff]   ;;  %v1505_v6 = vld [vmem:[#allocation4 + $0x50] sm:$0xff]   ;;  %vm372_vm1 = vcmask 1046528   ;;  %vm367_vm2 = vcmask 1047552   ;;  %vm1723_vm6 = vmmov 1  }
  0x6c   : > { %v1501_v2 = vld [vmem:[#allocation4 + $0x80] sm:$0xff]   ;;  %1301 = vmatpush3.bf16.msra.mxu0 %v1500_v1  ;;  %v1504_v5 = vld [vmem:[#allocation4 + $0x88] sm:$0xff]   ;;  %v1506_v7 = vld [vmem:[#allocation4 + $0x10] sm:$0xff]   ;;  %v699_v1 = vlaneseq  ;;  %s1294_s17 = sshll.u32 %s1707_s27, 7  ;;  %s1096_s20 = sshll.u32 %s274_s19, 4  ;;  %s1952_s20 = int_to_ptr.vmem [resolvable:$true] %s1096_s20 }
  0x6d   : > { %1376 = vmatprep.subr.bf16.mxu1 %v1501_v2  ;;  %1302 = vmatprep.subr.bf16.mxu0 %v1502_v3  ;;  %v1507_v8 = vld [vmem:[#allocation4 + $0x90] sm:$0xff]   ;;  %v1508_v9 = vld [vmem:[#allocation4 + $0x58] sm:$0xff]   ;;  %v1511_v12 = vld [vmem:[#allocation4 + $0x60] sm:$0xff]   ;;  %s1950_s9 = scalar_lea.hbm %s2011_s7, %s1294_s17  ;;  %s1958_s27 = scalar_lea.sflag [#allocation6], %s272_s14 }
  0x6e   : > { %1377 = vmatpush3.bf16.msra.mxu1 %v1501_v2  ;;  %v1509_v10 = vld [vmem:[#allocation4 + $0x18] sm:$0xff]   ;;  %v1513_v13 = vld [vmem:[#allocation4 + $0xa0] sm:$0xff]   ;;  %v1514_v15 = vld [vmem:[#allocation4 + $0x68] sm:$0xff]   ;;  %s1627_s21 = scalar_lea.vmem %s1952_s20, 128  ;;  %p2030_p4 = scmp.ne.s32.totalorder %s2020_s11, 0 }
  0x6f   : > { %1378 = vmatprep.subr.bf16.mxu1 %v1504_v5  ;;  %v1510_v11 = vld [vmem:[#allocation4 + $0x98] sm:$0xff]   ;;  %v1512_v14 = vld [vmem:[#allocation4 + $0x20] sm:$0xff]   ;;  %v1516_v16 = vld [vmem:[#allocation4 + $0xa8] sm:$0xff]   ;;  %p1628_p0 = scmp.ne.s32.totalorder %s1952_s20, %s1627_s21  ;;  %s1724_s22 = smov [#allocation9]  }
  0x70   : > { %1303 = vmatpush3.bf16.msra.mxu0 %v1503_v4  ;;  %v1515_v17 = vld [vmem:[#allocation4 + $0x28] sm:$0xff]   ;;  %v1517_v18 = vld [vmem:[#allocation4 + $0x70] sm:$0xff]   ;;  %v1520_v21 = vld [vmem:[#allocation4 + $0x78] sm:$0xff]   ;;  %v700_v4 = vshrl.u32 %v699_v1, 7  ;;  %s1631_s23 = sshll.u32 %s1724_s22, 4  ;;  %s1632_s23 = int_to_ptr.vmem [resolvable:$false] %s1631_s23 }
  0x71   : > { %1304 = vmatprep.subr.bf16.mxu0 %v1505_v6  ;;  %v1518_v19 = vld [vmem:[#allocation4 + $0x30] sm:$0xff]   ;;  %v346_v22 = vld [vmem:[#allocation2] sm:$0xff]  ;;  %v347_v23 = vld [vmem:[#allocation2 + $0x8] sm:$0xff]  ;;  %p1629_p13 = pnand %p1628_p0, %p2030_p4  ;;  %s1633_s30 = scalar_lea.vmem %s1632_s23, 256 }
  0x72   : > { %1379 = vmatpush3.bf16.msra.mxu1 %v1504_v5  ;;  %v1519_v20 = vld [vmem:[#allocation4 + $0xb0] sm:$0xff]   ;;  %v350_v24 = vshrl.u32 %v346_v22, 16  ;;  %v352_v25 = vshll.u32 %v346_v22, 16  ;;  %v357_v26 = vshll.u32 %v347_v23, 16  ;;  %v373_v27 = vrot.slane %v346_v22, 1  ;;  %v1521_v28 = vld [vmem:[#allocation4 + $0x38] sm:$0xff]   ;;  %vm1914_vm3 = vmand %vm367_vm2, %vm348_vm0  ;;  %p1634_p8 = scmp.lt.s32.totalorder %s1952_s20, %s1632_s23  ;;  %p1635_p10 = scmp.lt.s32.totalorder %s1633_s30, %s1627_s21 }
  0x73   : > { %1380 = vmatprep.subr.bf16.mxu1 %v1507_v8  ;;  %v1522_v29 = vld [vmem:[#allocation4 + $0xb8] sm:$0xff]   ;;  %v374_v30 = vrot.slane %v347_v23, 1  ;;  %v361_v31 = vshrl.u32 %v347_v23, 16  ;;  %v1523_v36 = vld [vmem:[#allocation7 + $0x80] sm:$0xff]   ;;  %v1526_v43 = vld [vmem:[#allocation7 + $0x88] sm:$0xff]   ;;  %p1630_p1 = pneg %p1629_p13 }
  0x74   : > { %1305 = vmatpush3.bf16.msra.mxu0 %v1506_v7  ;;  %v354_v32 = vrot.slane %v352_v25, 1  ;;  %v359_v33 = vrot.slane %v357_v26, 1  ;;  %v1524_v37 = vld [vmem:[#allocation7 + $0x40] sm:$0xff]   ;;  %v1527_v45 = vld [vmem:[#allocation7 + $0x48] sm:$0xff]   ;;  %v1529_v47 = vld [vmem:[#allocation7 + $0x90] sm:$0xff]   ;;  %p1636_p11 = por %p1635_p10, %p1634_p8 }
  0x75   : > { %1306 = vmatprep.subr.bf16.mxu0 %v1508_v9  ;;  %v375_v35 = vsel %vm372_vm1, %v373_v27, %v374_v30  ;;  %v1525_v40 = vld [vmem:[#allocation7] sm:$0xff]   ;;  %v380_v44 = vsel %vm372_vm1, %v374_v30, %v373_v27  ;;  %v1528_v46 = vld [vmem:[#allocation7 + $0x8] sm:$0xff]   ;;  %v1530_v48 = vld [vmem:[#allocation7 + $0x50] sm:$0xff]  }
  0x76   : > { %1381 = vmatpush3.bf16.msra.mxu1 %v1507_v8  ;;  %v355_v38 = vor.u32 %v354_v32, %v350_v24  ;;  %1392 = vmatprep.mubr.bf16.mxu1 %v375_v35  ;;  %v363_v39 = vor.u32 %v361_v31, %v359_v33  ;;  %v1531_v49 = vld [vmem:[#allocation7 + $0x10] sm:$0xff]   ;;  %v1532_v50 = vld [vmem:[#allocation7 + $0x98] sm:$0xff]   ;;  %v1535_v53 = vld [vmem:[#allocation7 + $0xa0] sm:$0xff]   ;;  %p1637_p2 = pnand %p1636_p11, %p1630_p1 }
  0x77   : > { %1382 = vmatprep.subr.bf16.mxu1 %v1510_v11  ;;  %v1533_v51 = vld [vmem:[#allocation7 + $0x58] sm:$0xff]   ;;  %v1536_v54 = vld [vmem:[#allocation7 + $0x60] sm:$0xff]   ;;  %v1538_v56 = vld [vmem:[#allocation7 + $0xa8] sm:$0xff]  }
  0x78   : > { %1307 = vmatpush3.bf16.msra.mxu0 %v1509_v10  ;;  %v360_v41 = vsel %vm348_vm0, %v355_v38, %v359_v33  ;;  %v369_v42 = vsel %vm1914_vm3, %v363_v39, %v354_v32  ;;  %v1534_v52 = vld [vmem:[#allocation7 + $0x18] sm:$0xff]   ;;  %v1537_v55 = vld [vmem:[#allocation7 + $0x20] sm:$0xff]   ;;  %v1539_v57 = vld [vmem:[#allocation7 + $0x68] sm:$0xff]  }
  0x79   : > { %1308 = vmatprep.subr.bf16.mxu0 %v1511_v12  ;;  %606 = vmatprep.mubr.bf16.mxu0 %v360_v41  ;;  %v1540_v58 = vld [vmem:[#allocation7 + $0x28] sm:$0xff]   ;;  %v1541_v59 = vld [vmem:[#allocation7 + $0xb0] sm:$0xff]   ;;  %v1544_v62 = vld [vmem:[#allocation7 + $0xb8] sm:$0xff]  }
  0x7a   : > { %1383 = vmatpush3.bf16.msra.mxu1 %v1510_v11  ;;  %v1542_v60 = vld [vmem:[#allocation7 + $0x70] sm:$0xff]   ;;  %v1545_v63 = vld [vmem:[#allocation7 + $0x78] sm:$0xff]   ;;  %v1246_v10 = vld [vmem:[%s2006_s2] ss:$0 sm:$0xff] }
  0x7b   : > { %1384 = vmatprep.subr.bf16.mxu1 %v1513_v13  ;;  %v1543_v61 = vld [vmem:[#allocation7 + $0x30] sm:$0xff]   ;;  %v1546_v0 = vld [vmem:[#allocation7 + $0x38] sm:$0xff]   ;;  %v1278_v34 = vld [vmem:[%s2009_s5] ss:$0 sm:$0xff] }
  0x7c   : > { %1309 = vmatpush3.bf16.msra.mxu0 %v1512_v14  ;;  %v1247_v14 = vld [vmem:[%s2007_s3] ss:$0 sm:$0xff] }
  0x7d   : > { %1310 = vmatprep.subr.bf16.mxu0 %v1514_v15  ;;  %v705_v15 = vadd.s32 4294967295, %v700_v4 }
  0x7e   : > { %1385 = vmatpush3.bf16.msra.mxu1 %v1513_v13 }
  0x7f   : > { %1386 = vmatprep.subr.bf16.mxu1 %v1516_v16  ;;  %vm709_vm4 = vcmp.ge.s32.totalorder %v705_v15, 0 }
  0x80   : > { %1311 = vmatpush3.bf16.msra.mxu0 %v1515_v17  ;;  %vm1272_vm7 = vmpackc.low %vm1723_vm6, %vm709_vm4 }
  0x81   : > { %1312 = vmatprep.subr.bf16.mxu0 %v1517_v18 }
  0x82   : > { %1387 = vmatpush3.bf16.msra.mxu1 %v1516_v16 }
  0x83   : > { %1388 = vmatprep.subr.bf16.mxu1 %v1519_v20 }
  0x84   : > { %1313 = vmatpush3.bf16.msra.mxu0 %v1518_v19 }
  0x85   : > { %1314 = vmatprep.subr.bf16.mxu0 %v1520_v21 }
  0x86   : > { %1389 = vmatpush3.bf16.msra.mxu1 %v1519_v20 }
  0x87   : > { %1390 = vmatprep.subr.bf16.mxu1 %v1522_v29 }
  0x88   : > { %1315 = vmatpush3.bf16.msra.mxu0 %v1521_v28 }
  0x89   : > { %1338 = vmatprep.subr.bf16.mxu0 %v1524_v37 }
  0x8a   : > { %1391 = vmatpush3.bf16.msra.mxu1 %v1522_v29 }
  0x8b   : > { %607 = vmatmul.mubr.bf16.vlgmr.msra.gmra.mrb[0].mxu0 %v346_v22  ;;  %1396 = vmatprep.subr.bf16.mxu1 %v1523_v36 }
  0x8c   : > { %614 = vmatprep.mubr.bf16.mxu0 %v369_v42  ;;  %1339 = vmatpush3.bf16.msra.mxu0 %v1525_v40  ;;  %v1722_v42 = vmov 0.0  }
  0x8d   : > { %1393 = vmatmul.mubr.bf16.vlgmr.msra.gmra.mrb[0].mxu1 %v380_v44  ;;  %1340 = vmatprep.subr.bf16.mxu0 %v1527_v45 }
  0x8e   : > { %1397 = vmatpush3.bf16.msra.mxu1 %v1523_v36 }
  0x8f   : > { %1398 = vmatprep.subr.bf16.mxu1 %v1526_v43 }
  0x90   : > { %1341 = vmatpush3.bf16.msra.mxu0 %v1528_v46 }
  0x91   : > { %1342 = vmatprep.subr.bf16.mxu0 %v1530_v48 }
  0x92   : > { %1399 = vmatpush3.bf16.msra.mxu1 %v1526_v43 }
  0x93   : > { %615 = vmatmul.mubr.bf16.gmra.mrb[4].mxu0 %v347_v23  ;;  %1400 = vmatprep.subr.bf16.mxu1 %v1529_v47  ;;  %v702_v23 = vadd.s32 16, %v700_v4  ;;  %v1279_v4 = vld [vmem:[%s2010_s6] ss:$0 sm:$0xff] }
  0x94   : > { %1343 = vmatpush3.bf16.msra.mxu0 %v1531_v49 }
  0x95   : > { %1344 = vmatprep.subr.bf16.mxu0 %v1533_v51  ;;  %v707_v32 = vadd.s32 4294967295, %v702_v23 }
  0x96   : > { %1401 = vmatpush3.bf16.msra.mxu1 %v1529_v47 }
  0x97   : > { %1402 = vmatprep.subr.bf16.mxu1 %v1532_v50  ;;  %vm715_vm5 = vcmp.lt.s32.totalorder %v707_v32, 16 }
  0x98   : > { %1345 = vmatpush3.bf16.msra.mxu0 %v1534_v52  ;;  %vm1275_vm8 = vmpackc.low %vm1723_vm6, %vm715_vm5 }
  0x99   : > { %1346 = vmatprep.subr.bf16.mxu0 %v1536_v54 }
  0x9a   : > { %1403 = vmatpush3.bf16.msra.mxu1 %v1532_v50 }
  0x9b   : > { %1404 = vmatprep.subr.bf16.mxu1 %v1535_v53 }
  0x9c   : > { %1347 = vmatpush3.bf16.msra.mxu0 %v1537_v55 }
  0x9d   : > { %1348 = vmatprep.subr.bf16.mxu0 %v1539_v57 }
  0x9e   : > { %1405 = vmatpush3.bf16.msra.mxu1 %v1535_v53 }
  0x9f   : > { %1406 = vmatprep.subr.bf16.mxu1 %v1538_v56 }
  0xa0   : > { %1349 = vmatpush3.bf16.msra.mxu0 %v1540_v58 }
  0xa1   : > { %1350 = vmatprep.subr.bf16.mxu0 %v1542_v60 }
  0xa2   : > { %1407 = vmatpush3.bf16.msra.mxu1 %v1538_v56 }
  0xa3   : > { %1408 = vmatprep.subr.bf16.mxu1 %v1541_v59 }
  0xa4   : > { %1351 = vmatpush3.bf16.msra.mxu0 %v1543_v61 }
  0xa5   : > { %1352 = vmatprep.subr.bf16.mxu0 %v1545_v63 }
  0xa6   : > { %1409 = vmatpush3.bf16.msra.mxu1 %v1541_v59 }
  0xa7   : > { %1410 = vmatprep.subr.bf16.mxu1 %v1544_v62 }
  0xa8   : > { %1353 = vmatpush3.bf16.msra.mxu0 %v1546_v0 }
  0xaa   : > { %1411 = vmatpush3.bf16.msra.mxu1 %v1544_v62 }
 0x15e   : > { %v1316_v2 = vpop.f32.mrb[0].mxu0 }
 0x15f   : > { %v1317_v3 = vpop.f32.mrb[1].mxu0 }
 0x160   : > { %v1318_v5 = vadd.f32 %v1317_v3, %v1316_v2  ;;  %v1319_v6 = vpop.f32.mrb[2].mxu0  ;;  %v1394_v7 = vpop.f32.mrb[0].mxu1 }
 0x161   : > { %v1320_v8 = vpop.f32.mrb[3].mxu0  ;;  %v657_v9 = vpop.f32.mrb[1].mxu1 }
 0x162   : > { %v1321_v11 = vadd.f32 %v1320_v8, %v1319_v6  ;;  %v658_v12 = vadd.f32 %v1318_v5, %v657_v9  ;;  %v1395_v13 = vpop.f32.mrb[2].mxu1 }
 0x163   : > { %v660_v16 = vpop.f32.mrb[3].mxu1 }
 0x164   : > { %v679_v17 = vmul.f32 %v1246_v10, %v658_v12  ;;  %v661_v18 = vadd.f32 %v1321_v11, %v660_v16 }
 0x166   : > { %v690_v19 = vadd.f32 %v1247_v14, %v679_v17  ;;  %v680_v20 = vmul.f32 %v1246_v10, %v661_v18  ;;  %v1322_v21 = vpop.f32.mrb[4].mxu0 }
 0x167   : > { %v1323_v22 = vpop.f32.mrb[5].mxu0 }
 0x168   : > { %v694_v24 = vmax.f32 %v690_v19, 0.0  ;;  %v691_v25 = vadd.f32 %v1247_v14, %v680_v20  ;;  %v1324_v26 = vadd.f32 %v1323_v22, %v1322_v21  ;;  %v1325_v27 = vpop.f32.mrb[6].mxu0 }
 0x169   : > { %v1326_v28 = vpop.f32.mrb[7].mxu0 }
 0x16a   : > { %v729_v29 = vsel %vm709_vm4, %v694_v24, 0.0  ;;  %v695_v30 = vmax.f32 %v691_v25, 0.0  ;;  %v666_v31 = vadd.f32 %v1394_v7, %v1324_v26 }
 0x16c   : > { %v733_v33 = vpack.c.bf16 %v695_v30, %v729_v29  ;;  %v1273_v35 = vpack.c.bf16 %v695_v30, %v694_v24  ;;  %v681_v36 = vmul.f32 %v1246_v10, %v666_v31 }
 0x16e   : > { %v692_v37 = vadd.f32 %v1247_v14, %v681_v36  ;;  %v738_v38 = vshll.u32 %v733_v33, 16  ;;  %v736_v44 = vshrl.u32 %v733_v33, 16  ;;  %v756_v45 = vrot.slane %v733_v33, 1 }
 0x170   : > { %v696_v39 = vmax.f32 %v692_v37, 0.0  ;;  %v740_v41 = vrot.slane %v738_v38, 1 }
 0x172   : > { %v731_v40 = vsel %vm715_vm5, %v696_v39, 0.0  ;;  %v741_v48 = vor.u32 %v740_v41, %v736_v44  ;;  %v1276_v56 = vpack.c.bf16 %v1722_v42, %v696_v39 }
 0x173   : > { %v734_v43 = vpack.c.bf16 %v1722_v42, %v731_v40 }
 0x175   : > { %v757_v46 = vrot.slane %v734_v43, 1  ;;  %v743_v47 = vshll.u32 %v734_v43, 16  ;;  %v747_v52 = vshrl.u32 %v734_v43, 16 }
 0x177   : > { %v758_v49 = vsel %vm372_vm1, %v756_v45, %v757_v46  ;;  %v762_v50 = vsel %vm372_vm1, %v757_v46, %v756_v45  ;;  %v745_v51 = vrot.slane %v743_v47, 1 }
 0x178   : > { %1412 = vmatprep.mubr.bf16.mxu1 %v758_v49 }
 0x179   : > { %1413 = vmatmul.mubr.bf16.vlgmr.msra.gmra.mrb[4].mxu1 %v762_v50  ;;  %v746_v53 = vsel %vm348_vm0, %v741_v48, %v745_v51  ;;  %v749_v54 = vor.u32 %v747_v52, %v745_v51 }
 0x17a   : > { %988 = vmatprep.mubr.bf16.mxu0 %v746_v53 }
 0x17b   : > { %1274 = vmatmul.mubr.msk.bf16.vlgmr.msra.gmra.mrb[8].mxu0 %vm1272_vm7, %v1273_v35  ;;  %v753_v55 = vsel %vm1914_vm3, %v749_v54, %v740_v41 }
 0x17c   : > { %996 = vmatprep.mubr.bf16.mxu0 %v753_v55 }
 0x183   : > { %1277 = vmatmul.mubr.msk.bf16.gmra.mrb[12].mxu0 %vm1275_vm8, %v1276_v56 }
 0x24c   : > { %v1414_v57 = vpop.f32.mrb[4].mxu1 }
 0x24d   : > { %v1037_v58 = vpop.f32.mrb[5].mxu1 }
 0x24e   : > { %v1354_v59 = vpop.f32.mrb[8].mxu0  ;;  %v1415_v60 = vpop.f32.mrb[6].mxu1 }
 0x24f   : > { %v1355_v61 = vpop.f32.mrb[9].mxu0  ;;  %v1040_v62 = vpop.f32.mrb[7].mxu1 }
 0x250   : > { %v1356_v63 = vadd.f32 %v1355_v61, %v1354_v59  ;;  %v1357_v0 = vpop.f32.mrb[10].mxu0 }
 0x251   : > { %v1358_v1 = vpop.f32.mrb[11].mxu0 }
 0x252   : > { %v1038_v2 = vadd.f32 %v1356_v63, %v1037_v58  ;;  %v1359_v3 = vadd.f32 %v1358_v1, %v1357_v0 }
 0x254   : > { %v1057_v5 = vmul.f32 %v1278_v34, %v1038_v2  ;;  %v1041_v6 = vadd.f32 %v1359_v3, %v1040_v62 }
 0x256   : > { %v1066_v7 = vadd.f32 %v1279_v4, %v1057_v5  ;;  %v1058_v8 = vmul.f32 %v1278_v34, %v1041_v6  ;;  %v1360_v9 = vpop.f32.mrb[12].mxu0 }
 0x257   : > { %v1361_v10 = vpop.f32.mrb[13].mxu0 }
 0x258   : > { %v1067_v11 = vadd.f32 %v1279_v4, %v1058_v8  ;;  %v1363_v12 = vpop.f32.mrb[14].mxu0  ;;  %v1068_v14 = vmax.f32 %v1066_v7, 0.0 }
 0x259   : > { %v1364_v13 = vpop.f32.mrb[15].mxu0 }
 0x25a   : > { %v1069_v15 = vmax.f32 %v1067_v11, 0.0 }
 0x25c   : > { %v1298_v16 = vpack.c.bf16 %v1069_v15, %v1068_v14 }
 0x25e   : > { %1299 = vst [vmem:[%s274_s19] sm:$0xff] %v1298_v16  }
 0x25f   : > { %1640 = shalt.err (!%p1637_p2)
}
 0x260   : > { %s1641_s14 = scalar_lea.hbm %s1950_s9, 128  ;;  %s1645_s8 = scalar_lea.hbm %s2011_s7, 256 }
 0x261   : > { %p1642_p3 = scmp.ne.s32.totalorder %s1950_s9, %s1641_s14  ;;  %p1646_p7 = scmp.lt.u32.totalorder %s1950_s9, %s2011_s7 }
 0x262   : > { %p1647_p9 = scmp.lt.u32.totalorder %s1645_s8, %s1641_s14  ;;  %p1649_p0 = scmp.lt.u32.totalorder %s1641_s14, %s1950_s9 }
 0x263   : > { %p1643_p5 = pnand %p1642_p3, %p2030_p4 }
 0x264   : > { %p1648_p12 = por %p1647_p9, %p1646_p7 }
 0x265   : > { %p1644_p6 = pneg %p1643_p5 }
 0x266   : > { %p1650_p13 = por %p1649_p0, %p1648_p12 }
 0x268   : > { %p1651_p1 = pnand %p1650_p13, %p1644_p6 }
 0x26a   : > { %1654 = shalt.err (!%p1651_p1)
}
 0x26b   : > { %s1725_s16 = smov 64   ;;  %s1726_s17 = smov 4  }
 0x26c   : > { %1424 = dma.vmem_to_hbm [thread:$0]  (%p2030_p4), %s1952_s20, 128, %s1950_s9, %s1958_s27, %s1725_s16, %s1725_s16, %s1726_s17  }
 0x26d PF: > { %p1441_p8 = scmp.ge.s32.totalorder %s1715_s29, 2  ;;  %s1111_s18 = sand.u32 1, %s1695_s24  }
 0x26e   : > { %p2031_p10 = scmp.ne.s32.totalorder %s2021_s13, 0  ;;  %s1112_s28 = scalar_lea.sflag [#allocation6], %s1111_s18 }
 0x270   : > { %p1434_p11 = pnand %p1441_p8, %p2031_p10 }
 0x272   : > { %1690 = dma.done.wait (!%p1434_p11), %s1112_s28, 128  }
 0x273   : > { %1692 = vsyncadd (!%p1434_p11), %s1112_s28, 4294967168  ;;  %s22_s29 = sadd.s32 1, %s1715_s29   ;;  %s2032_s21 = sld [smem:[#allocation22_spill]] }
 0x274   : > { %p19_p2 = scmp.ge.s32.totalorder %s22_s29, 4   ;;  %s2033_s27 = sld [smem:[#allocation20_spill]] }
 0x275   : > { %s2034_s28 = sld [smem:[#allocation21_spill]]  ;;  %s2035_s24 = smov %s1699_s25 }
 0x276   : > { %s2036_s25 = smov %s1703_s26  ;;  %21 = sbr.rel (!%p19_p2) target bundleno = 6 (0x6), region = 110 }
 0x279   : > { %s2037_s26 = smov %s2032_s21 }
 0x27d   :  { %1117 = vsyncpa [#allocation5], 1 }
 0x27e   :  { %1119 = vsyncpa [#allocation5 + $0x1], 1 }
 0x27f   :  { %1120 = vsyncpa [#allocation8], 1 }
 0x280   :  { %1121 = vsyncpa [#allocation6], 1 }
 0x281   :  { %1123 = vsyncpa [#allocation6 + $0x1], 1 }
 0x282   :  { %1124 = vsyncmov [#allocation3] }
 0x285   :  { %s1125_s11 = vpop.sfrf %1124 }
 0x286   :  { %p1287_p4 = scmp.ne.s32.totalorder %s1125_s11, 0 }
 0x288   :  { %1129 = shalt.err (%p1287_p4)  }
 0x289   :  { %1131 = vsyncmov [#allocation3 + $0x1] }
 0x28c   :  { %s1132_s13 = vpop.sfrf %1131 }
 0x28d   :  { %p1288_p3 = scmp.ne.s32.totalorder %s1132_s13, 0 }
 0x28f   :  { %1136 = shalt.err (%p1288_p3)  }

</bundles_post_ra>
